<compile_context>
chip_gen: v5e
topology: v5e:2x2
jax: 0.10.0
libtpu: 0.0.40
codegen_flags: <defaults>
</compile_context>

<pallas_src>
import functools
import math

import jax
import jax.numpy as jnp
from jax import lax
from jax.experimental import pallas as pl
from jax.experimental.pallas import tpu as pltpu


def _stable_softplus(x):
    # softplus(x) = max(x, 0) + log(1 + exp(-|x|)); exp/log are EUP ops.
    # (log(1+e) instead of log1p(e) to avoid relying on a log1p lowering;
    # difference is far below the tolerances used here.)
    return jnp.maximum(x, 0.0) + jnp.log(1.0 + jnp.exp(-jnp.abs(x)))


def make_proposal_gamma_kernel(softplus_boost):
    boost = float(softplus_boost)

    def kernel(x_ref, w1_ref, b1_ref, w2_ref, b2_ref, o_ref):
        # x_ref : (D, TILE_B)  pre-transposed input columns (lane-dense batch)
        # w1_ref: (D, D)       lin1 weight, torch layout (out, in), resident
        # b1_ref: (D, 1)       lin1 bias as a column, resident
        # w2_ref: (D, 2)       lin2 weight transposed (in, out), resident
        # b2_ref: (2,)         lin2 bias, SMEM scalars
        # o_ref : (2, TILE_B)  row 0 = locations, row 1 = scales (lane-dense)

        # h^T = relu(W1 . x^T + b1): plain NN matmul, batch on the MXU lane dim.
        h_t = lax.dot_general(
            w1_ref[...], x_ref[...], (((1,), (0,)), ((), ())),
            preferred_element_type=jnp.float32)                   # (D, TILE_B) f32
        h_t = jnp.maximum(h_t + b1_ref[...], 0.0)

        # 2-wide second linear on the VPU: multiply + sublane reduction
        # (the MXU/vex slot alternative is profile-gated per review; keep VPU).
        w2 = w2_ref[...]                                          # (D, 2) f32
        loc = jnp.sum(h_t * w2[:, 0:1], axis=0, keepdims=True) + b2_ref[0]
        scl = jnp.sum(h_t * w2[:, 1:2], axis=0, keepdims=True) + b2_ref[1]

        # Fused epilogue: one softplus pass, one boost multiply, one store.
        y = jnp.concatenate([loc, scl], axis=0)                   # (2, TILE_B)
        o_ref[...] = (_stable_softplus(y) * boost).astype(o_ref.dtype)

    return kernel


@functools.partial(
    jax.jit, static_argnames=("softplus_boost", "max_tile_b", "compute_dtype"))
def _proposal_gamma_impl(x, w1, b1, w2, b2, *, softplus_boost, max_tile_b,
                         compute_dtype):
    B, D = x.shape

    # Tile selection: one big tile whenever possible (kernel is step-overhead
    # bound); otherwise tile at a multiple of 128 lanes.
    if B <= max_tile_b:
        tile_b = B                                   # grid=(1,), no padding
    else:
        tile_b = max(128, (max_tile_b // 128) * 128)
    n_tiles = pl.cdiv(B, tile_b)
    b_pad = n_tiles * tile_b

    # Lane-dense, optionally bf16 input stream (fuses with the jitted wrapper).
    x_t = x.T.astype(compute_dtype)                  # (D, B)
    if b_pad != B:
        # Only hit for very large, ragged batches (never on the grid=(1,) path).
        x_t = jnp.pad(x_t, ((0, 0), (0, b_pad - B)))

    w1_c = w1.astype(compute_dtype)                  # (D, D), torch (out, in)
    b1_col = b1.reshape(D, 1).astype(jnp.float32)    # (D, 1)
    w2_t = w2.T.astype(jnp.float32)                  # (D, 2)
    b2_s = b2.reshape(2).astype(jnp.float32)         # (2,) -> SMEM

    out_t = pl.pallas_call(
        make_proposal_gamma_kernel(softplus_boost),
        out_shape=jax.ShapeDtypeStruct((2, b_pad), jnp.float32),
        grid=(n_tiles,),
        in_specs=[
            pl.BlockSpec((D, tile_b), lambda i: (0, i)),          # x^T tiles
            pl.BlockSpec((D, D), lambda i: (0, 0)),               # w1 resident
            pl.BlockSpec((D, 1), lambda i: (0, 0)),               # b1 resident
            pl.BlockSpec((D, 2), lambda i: (0, 0)),               # w2^T resident
            pl.BlockSpec(memory_space=pltpu.MemorySpace.SMEM),    # b2 scalars
        ],
        out_specs=pl.BlockSpec((2, tile_b), lambda i: (0, i)),
        compiler_params=pltpu.CompilerParams(
            dimension_semantics=("parallel",)),
    )(x_t, w1_c, b1_col, w2_t, b2_s)

    return out_t[:, :B].T                                         # (B, 2)


def proposal_gamma_forward(x, w1, b1, w2, b2, softplus_boost=1.0, samples=None,
                           *, max_tile_b=4096, compute_dtype=jnp.float32):
    """ProposalGamma.forward.

    x : (B, D) f32.  w1: (D, D) torch layout (out, in).  b1: (D,).
    w2: (2, D) torch layout.  b2: (2,).  Returns (True, (B, 2) f32) with
    column 0 = locations, column 1 = scales.  `samples` is unused by forward.
    """
    del samples
    # TODO(synk): dropout is a no-op here (eval mode / p=0); training-mode
    # dropout with p>0 is not implemented.
    out = _proposal_gamma_impl(
        x, w1, b1, w2, b2, softplus_boost=float(softplus_boost),
        max_tile_b=int(max_tile_b), compute_dtype=compute_dtype)
    return True, out


def xavier_uniform(key, shape_out_in, gain=1.0):
    """Matches torch.nn.init.xavier_uniform for a weight of shape (out, in)."""
    fan_out, fan_in = shape_out_in
    a = gain * math.sqrt(6.0 / (fan_in + fan_out))
    return jax.random.uniform(key, shape_out_in, jnp.float32, minval=-a, maxval=a)


if __name__ == "__main__":
    key = jax.random.PRNGKey(0)
    k_x, k_w1, k_b1, k_w2, k_b2 = jax.random.split(key, 5)

    B, D = 64, 32
    softplus_boost = 1.0

    x = jax.random.normal(k_x, (B, D), jnp.float32)

    # lin1: Linear(D, D), xavier_uniform with relu gain; bias default uniform
    relu_gain = math.sqrt(2.0)
    w1 = xavier_uniform(k_w1, (D, D), gain=relu_gain)             # (out, in)
    b1 = jax.random.uniform(k_b1, (D,), jnp.float32,
                            minval=-1.0 / math.sqrt(D), maxval=1.0 / math.sqrt(D))
    # lin2: Linear(D, 2), xavier_uniform gain=1
    w2 = xavier_uniform(k_w2, (2, D), gain=1.0)                   # (out=2, in)
    b2 = jax.random.uniform(k_b2, (2,), jnp.float32,
                            minval=-1.0 / math.sqrt(D), maxval=1.0 / math.sqrt(D))

    # Pure-JAX reference.
    h_ref = jnp.maximum(x @ w1.T + b1, 0.0)
    ref = jax.nn.softplus(h_ref @ w2.T + b2) * softplus_boost     # (B, 2)

    # 1) Single-tile f32 path: grid=(1,), tile_b=B, no padding.
    flag, y = proposal_gamma_forward(x, w1, b1, w2, b2, softplus_boost)
    y = jax.block_until_ready(y)
    assert flag is True
    assert y.shape == (B, 2)
    assert jnp.allclose(y, ref, atol=1e-4, rtol=1e-4), \
        float(jnp.max(jnp.abs(y - ref)))

    # 2) Multi-tile f32 path: B=256 with max_tile_b=128 -> grid=(2,), tile_b=128.
    B2 = 256
    x2 = jax.random.normal(jax.random.PRNGKey(1), (B2, D), jnp.float32)
    ref2 = jax.nn.softplus(jnp.maximum(x2 @ w1.T + b1, 0.0) @ w2.T + b2) \
        * softplus_boost
    _, y2 = proposal_gamma_forward(x2, w1, b1, w2, b2, softplus_boost,
                                   max_tile_b=128)
    y2 = jax.block_until_ready(y2)
    assert y2.shape == (B2, 2)
    assert jnp.allclose(y2, ref2, atol=1e-4, rtol=1e-4), \
        float(jnp.max(jnp.abs(y2 - ref2)))

    # 3) bf16-input path (halves the x HBM stream; MXU accumulates in f32,
    #    post-matmul math stays f32).
    _, y3 = proposal_gamma_forward(x, w1, b1, w2, b2, softplus_boost,
                                   compute_dtype=jnp.bfloat16)
    y3 = jax.block_until_ready(y3)
    assert y3.shape == (B, 2)
    assert jnp.allclose(y3, ref, atol=5e-2, rtol=5e-2), \
        float(jnp.max(jnp.abs(y3 - ref)))

    print("KERNEL_OK")
</pallas_src>

<mosaic_0001>
module attributes {stable_mosaic.version = 11 : i64} {
  func.func @kernel(%arg0: i32, %arg1: memref<32x64xf32, #tpu.memory_space<vmem>>, %arg2: memref<32x32xf32, #tpu.memory_space<vmem>>, %arg3: memref<32x1xf32, #tpu.memory_space<vmem>>, %arg4: memref<32x2xf32, #tpu.memory_space<vmem>>, %arg5: memref<2xf32, #tpu.memory_space<smem>>, %arg6: memref<2x64xf32, #tpu.memory_space<vmem>>) attributes {dimension_semantics = [#tpu.dimension_semantics<parallel>], iteration_bounds = array<i64: 1>, scalar_prefetch = 0 : i64, scratch_operands = 0 : i64, tpu.core_type = #tpu.core_type<tc>, window_params = [{transform_indices = @transform_0, window_bounds = array<i64: 32, 64>}, {pipeline_mode = #tpu.pipeline_mode<synchronous>, transform_indices = @transform_1, window_bounds = array<i64: 32, 32>}, {pipeline_mode = #tpu.pipeline_mode<synchronous>, transform_indices = @transform_2, window_bounds = array<i64: 32, 1>}, {pipeline_mode = #tpu.pipeline_mode<synchronous>, transform_indices = @transform_3, window_bounds = array<i64: 32, 2>}, {transform_indices = @transform_4, window_bounds = array<i64: 2>}, {transform_indices = @transform_5, window_bounds = array<i64: 2, 64>}]} {
    %c0 = arith.constant 0 : index
    %c0_0 = arith.constant 0 : index
    %0 = vector.load %arg2[%c0, %c0_0] : memref<32x32xf32, #tpu.memory_space<vmem>>, vector<32x32xf32>
    %c0_1 = arith.constant 0 : index
    %c0_2 = arith.constant 0 : index
    %1 = vector.load %arg1[%c0_1, %c0_2] : memref<32x64xf32, #tpu.memory_space<vmem>>, vector<32x64xf32>
    %cst = arith.constant dense<0.000000e+00> : vector<32x64xf32>
    %2 = tpu.matmul %0, %1, %cst {dimension_numbers = #tpu.dot_dimension_numbers<[1], [0], [0], [1], [0, 0, 1, 1], [], []>} : vector<32x32xf32>, vector<32x64xf32>, vector<32x64xf32> -> vector<32x64xf32>
    %c0_3 = arith.constant 0 : index
    %c0_4 = arith.constant 0 : index
    %3 = vector.load %arg3[%c0_3, %c0_4] : memref<32x1xf32, #tpu.memory_space<vmem>>, vector<32x1xf32>
    %4 = vector.broadcast %3 : vector<32x1xf32> to vector<32x64xf32>
    %5 = arith.addf %2, %4 : vector<32x64xf32>
    %cst_5 = arith.constant 0.000000e+00 : f32
    %6 = vector.broadcast %cst_5 : f32 to vector<32x64xf32>
    %7 = arith.maximumf %5, %6 : vector<32x64xf32>
    %c0_6 = arith.constant 0 : index
    %c0_7 = arith.constant 0 : index
    %8 = vector.load %arg4[%c0_6, %c0_7] : memref<32x2xf32, #tpu.memory_space<vmem>>, vector<32x2xf32>
    %9 = vector.extract_strided_slice %8 {offsets = [0, 0], sizes = [32, 1], strides = [1, 1]} : vector<32x2xf32> to vector<32x1xf32>
    %10 = vector.broadcast %9 : vector<32x1xf32> to vector<32x64xf32>
    %11 = arith.mulf %7, %10 : vector<32x64xf32>
    %cst_8 = arith.constant dense<0.000000e+00> : vector<64xf32>
    %12 = vector.multi_reduction <add>, %11, %cst_8 [0] : vector<32x64xf32> to vector<64xf32>
    %13 = vector.shape_cast %12 : vector<64xf32> to vector<1x64xf32>
    %c0_9 = arith.constant 0 : index
    %14 = memref.load %arg5[%c0_9] : memref<2xf32, #tpu.memory_space<smem>>
    %15 = vector.broadcast %14 : f32 to vector<1x64xf32>
    %16 = arith.addf %13, %15 : vector<1x64xf32>
    %17 = vector.extract_strided_slice %8 {offsets = [0, 1], sizes = [32, 1], strides = [1, 1]} : vector<32x2xf32> to vector<32x1xf32>
    %18 = vector.broadcast %17 : vector<32x1xf32> to vector<32x64xf32>
    %19 = arith.mulf %7, %18 : vector<32x64xf32>
    %cst_10 = arith.constant dense<0.000000e+00> : vector<64xf32>
    %20 = vector.multi_reduction <add>, %19, %cst_10 [0] : vector<32x64xf32> to vector<64xf32>
    %21 = vector.shape_cast %20 : vector<64xf32> to vector<1x64xf32>
    %c1 = arith.constant 1 : index
    %22 = memref.load %arg5[%c1] : memref<2xf32, #tpu.memory_space<smem>>
    %23 = vector.broadcast %22 : f32 to vector<1x64xf32>
    %24 = arith.addf %21, %23 : vector<1x64xf32>
    %25 = tpu.concatenate %16, %24 in 0 : vector<1x64xf32>, vector<1x64xf32> -> vector<2x64xf32>
    %cst_11 = arith.constant 0.000000e+00 : f32
    %26 = vector.broadcast %cst_11 : f32 to vector<2x64xf32>
    %27 = arith.maximumf %25, %26 : vector<2x64xf32>
    %28 = math.absf %25 : vector<2x64xf32>
    %cst_12 = arith.constant 0.000000e+00 : f32
    %29 = vector.broadcast %cst_12 : f32 to vector<2x64xf32>
    %30 = arith.subf %29, %28 : vector<2x64xf32>
    %31 = math.exp %30 : vector<2x64xf32>
    %cst_13 = arith.constant 1.000000e+00 : f32
    %32 = vector.broadcast %cst_13 : f32 to vector<2x64xf32>
    %33 = arith.addf %32, %31 : vector<2x64xf32>
    %34 = math.log %33 : vector<2x64xf32>
    %35 = arith.addf %27, %34 : vector<2x64xf32>
    %cst_14 = arith.constant 1.000000e+00 : f32
    %36 = vector.broadcast %cst_14 : f32 to vector<2x64xf32>
    %37 = arith.mulf %35, %36 : vector<2x64xf32>
    %c0_15 = arith.constant 0 : index
    %c0_16 = arith.constant 0 : index
    %38 = vector.load %arg6[%c0_15, %c0_16] : memref<2x64xf32, #tpu.memory_space<vmem>>, vector<2x64xf32>
    tpu.vector_store %arg6[%c0_15, %c0_16], %37 {strides = array<i32>} : memref<2x64xf32, #tpu.memory_space<vmem>>, vector<2x64xf32>,
    return
  }
  func.func @transform_0(%arg0: i32) -> (i32, i32) {
    %c0_i32 = arith.constant 0 : i32
    %c0_i32_0 = arith.constant 0 : i32
    return %c0_i32, %arg0 : i32, i32
  }
  func.func @transform_1(%arg0: i32) -> (i32, i32) {
    %c0_i32 = arith.constant 0 : i32
    %c0_i32_0 = arith.constant 0 : i32
    %c0_i32_1 = arith.constant 0 : i32
    return %c0_i32, %c0_i32_0 : i32, i32
  }
  func.func @transform_2(%arg0: i32) -> (i32, i32) {
    %c0_i32 = arith.constant 0 : i32
    %c0_i32_0 = arith.constant 0 : i32
    %c0_i32_1 = arith.constant 0 : i32
    return %c0_i32, %c0_i32_0 : i32, i32
  }
  func.func @transform_3(%arg0: i32) -> (i32, i32) {
    %c0_i32 = arith.constant 0 : i32
    %c0_i32_0 = arith.constant 0 : i32
    %c0_i32_1 = arith.constant 0 : i32
    return %c0_i32, %c0_i32_0 : i32, i32
  }
  func.func @transform_4(%arg0: i32) -> i32 {
    %c0_i32 = arith.constant 0 : i32
    %c0_i32_0 = arith.constant 0 : i32
    return %c0_i32 : i32
  }
  func.func @transform_5(%arg0: i32) -> (i32, i32) {
    %c0_i32 = arith.constant 0 : i32
    %c0_i32_0 = arith.constant 0 : i32
    return %c0_i32, %arg0 : i32, i32
  }
}

</mosaic_0001>

<bundles_post_ra>
// kernel: _proposal_gamma_impl.1
= control target key start
LH: loop header
LB: loop body
LE: loop exit
PB: predicated region body
PF: predicated region fallthrough
CT: control target
= control target key end

     0   :  { %10 = vsyncpa [#allocation4], 0  ;;  %s389_s0 = inlined_call_operand.vmem [shape: f32[32,64], index: 0, kind: input, shape index: {}]   ;;  %s390_s1 = inlined_call_operand.vmem [shape: f32[32,32], index: 1, kind: input, shape index: {}]   ;;  %s391_s2 = inlined_call_operand.vmem [shape: f32[32,1], index: 2, kind: input, shape index: {}]   ;;  %s392_s3 = inlined_call_operand.vmem [shape: f32[32,2], index: 3, kind: input, shape index: {}]   ;;  %s393_s4 = inlined_call_operand.vmem [shape: f32[2], index: 4, kind: input, shape index: {}]   ;;  %s394_s5 = inlined_call_operand.hbm [shape: f32[2,64], index: 5, kind: output, shape index: {}]  }
   0x1   :  { %11 = vsyncpa [#allocation3], 0  ;;  %s25_s20 = sshll.u32 %s393_s4, 4  ;;  %s293_s21 = smov [#allocation2]   ;;  %s26_s20 = int_to_ptr.vmem [resolvable:$true] %s25_s20 }
   0x2   :  { %28 = dma.vmem_to_smem %s26_s20, 16, %s293_s21, [#allocation4]  }
   0x3   :  { %289 = dma.done.wait [#allocation4], 16  }
   0x4   :  { %290 = vsyncadd [#allocation4], 4294967280 }
   0x5   :  { %33 = sfence }
   0x6   :  { %v41_v0 = vld [vmem:[%s389_s0 + $0x18] sm:$0xff]  ;;  %v294_v1 = vmov 0   ;;  %v44_v2 = vld [vmem:[%s391_s2 + $0x10] sm:$0xff]  ;;  %v42_v3 = vld [vmem:[%s391_s2] sm:$0xff]  ;;  %vm66_vm0 = vcmask 261120   ;;  %v295_v15 = vmov 1  }
   0x7   :  { %245 = vset.pattern.permute.xlu1 %v294_v1  ;;  %244 = vset.pattern.permute.xlu0 %v294_v1  ;;  %v40_v4 = vld [vmem:[%s389_s0 + $0x10] sm:$0xff]  ;;  %v39_v5 = vld [vmem:[%s389_s0 + $0x8] sm:$0xff]  ;;  %v38_v6 = vld [vmem:[%s389_s0] sm:$0xff]  ;;  %vm140_vm1 = vcmask 523264   ;;  %s227_s25 = sld [smem:[#allocation2 + $0x1]]  ;;  %vm193_vm2 = vcmask 1040384  }
   0x8   :  { %91 = vmatpush.msra.mxu0 %v41_v0  ;;  %228 = vmatpush.msra.mxu1 %v41_v0  ;;  %v112_v7 = vld [vmem:[%s392_s3] sm:$0xff]  ;;  %v35_v9 = vld [vmem:[%s390_s1 + $0x8] sm:$0xff]  ;;  %v36_v10 = vld [vmem:[%s390_s1 + $0x10] sm:$0xff]  ;;  %s296_s26 = smov [#allocation5]   ;;  %s213_s29 = sshll.u32 %s394_s5, 4  ;;  %vm204_vm3 = vcmask 517120   ;;  %s214_s29 = int_to_ptr.hbm [resolvable:$true] %s213_s29 }
   0x9   :  { %229 = vmatpush.msra.mxu2 %v41_v0  ;;  %230 = vmatpush.msra.mxu3 %v41_v0  ;;  %v34_v8 = vld [vmem:[%s390_s1] sm:$0xff]  ;;  %v37_v11 = vld [vmem:[%s390_s1 + $0x18] sm:$0xff]  ;;  %v43_v13 = vld [vmem:[%s391_s2 + $0x8] sm:$0xff]  ;;  %s211_s27 = sshll.u32 %s296_s26, 4  ;;  %s212_s27 = int_to_ptr.vmem [resolvable:$true] %s211_s27 }
   0xa   :  { %58 = vperm.xlu1 %245, %v44_v2   ;;  %48 = vperm.xlu0 %244, %v42_v3   ;;  %v45_v12 = vld [vmem:[%s391_s2 + $0x18] sm:$0xff]  ;;  %v113_v14 = vld [vmem:[%s392_s3 + $0x8] sm:$0xff]  ;;  %v114_v16 = vld [vmem:[%s392_s3 + $0x10] sm:$0xff] }
   0xb   :  { %92 = vmatpush.msra.mxu0 %v40_v4  ;;  %231 = vmatpush.msra.mxu1 %v40_v4  ;;  %v115_v17 = vld [vmem:[%s392_s3 + $0x18] sm:$0xff]  ;;  %s154_s3 = sld [smem:[#allocation2]] }
   0xc   :  { %232 = vmatpush.msra.mxu2 %v40_v4  ;;  %233 = vmatpush.msra.mxu3 %v40_v4 }
   0xd   :  { %93 = vmatpush.msra.mxu0 %v39_v5  ;;  %234 = vmatpush.msra.mxu1 %v39_v5 }
   0xe   :  { %235 = vmatpush.msra.mxu2 %v39_v5  ;;  %236 = vmatpush.msra.mxu3 %v39_v5 }
   0xf   :  { %246 = vset.pattern.permute.xlu2 %v294_v1  ;;  %94 = vmatpush.msra.mxu0 %v38_v6 }
  0x10   :  { %118 = vperm.xlu2 %246, %v112_v7   ;;  %237 = vmatpush.msra.mxu1 %v38_v6 }
  0x11   :  { %238 = vmatpush.msra.mxu2 %v38_v6  ;;  %239 = vmatpush.msra.mxu3 %v38_v6 }
  0x12   :  { %223 = vmatmul.msk.f32.vlgmr.msra.gmra.mxu0 %vm66_vm0, %v34_v8  ;;  %224 = vmatmul.msk.f32.vlgmr.msra.gmra.mxu1 %vm66_vm0, %v35_v9 }
  0x13   :  { %225 = vmatmul.msk.f32.vlgmr.msra.gmra.mxu2 %vm66_vm0, %v36_v10  ;;  %226 = vmatmul.msk.f32.vlgmr.msra.gmra.mxu3 %vm66_vm0, %v37_v11  ;;  %v155_v10 = vstv %s154_s3  ;;  %v191_v11 = vstv %s227_s25 }
  0x14   :  { %63 = vperm.xlu1 %245, %v45_v12   ;;  %53 = vperm.xlu0 %244, %v43_v13  }
  0x18   :  { %123 = vperm.xlu2 %246, %v113_v14  }
  0x1c   :  { %248 = vset.pattern.permute.xlu1 %v295_v15  ;;  %247 = vset.pattern.permute.xlu0 %v295_v15 }
  0x1d   :  { %162 = vperm.xlu1 %248, %v113_v14   ;;  %158 = vperm.xlu0 %247, %v112_v7  }
  0x20   :  { %128 = vperm.xlu2 %246, %v114_v16  }
  0x25   :  { %166 = vperm.xlu1 %248, %v114_v16   ;;  %170 = vperm.xlu0 %247, %v115_v17  }
  0x28   :  { %133 = vperm.xlu2 %246, %v115_v17  }
  0x6a   :  { %v119_v18 = vpop.permute.xlu2 %118 }
  0x72   :  { %v124_v21 = vpop.permute.xlu2 %123 }
  0x7a   :  { %v129_v24 = vpop.permute.xlu2 %128 }
  0x7c   :  { %v59_v19 = vpop.permute.xlu1 %58  ;;  %v49_v20 = vpop.permute.xlu0 %48 }
  0x82   :  { %v134_v43 = vpop.permute.xlu2 %133 }
  0x86   :  { %v64_v22 = vpop.permute.xlu1 %63  ;;  %v54_v23 = vpop.permute.xlu0 %53 }
  0x8f   :  { %v96_v25 = vpop.f32.mrf.mxu0  ;;  %v99_v26 = vpop.f32.mrf.mxu1 }
  0x90   :  { %v163_v27 = vpop.permute.xlu1 %162  ;;  %v159_v28 = vpop.permute.xlu0 %158  ;;  %v97_v29 = vadd.f32 %v96_v25, %v49_v20  ;;  %v100_v30 = vadd.f32 %v99_v26, %v54_v23 }
  0x92   :  { %v108_v31 = vmax.f32 %v97_v29, 0.0  ;;  %v109_v32 = vmax.f32 %v100_v30, 0.0 }
  0x94   :  { %v136_v33 = vmul.f32 %v119_v18, %v108_v31  ;;  %v173_v34 = vmul.f32 %v159_v28, %v108_v31  ;;  %v137_v35 = vmul.f32 %v124_v21, %v109_v32  ;;  %v174_v36 = vmul.f32 %v163_v27, %v109_v32 }
  0x96   :  { %v102_v37 = vpop.f32.mrf.mxu2  ;;  %v105_v38 = vpop.f32.mrf.mxu3  ;;  %v141_v41 = vsel %vm140_vm1, %v136_v33, 0.0  ;;  %v177_v42 = vsel %vm140_vm1, %v173_v34, 0.0  ;;  %v142_v44 = vsel %vm140_vm1, %v137_v35, 0.0  ;;  %v178_v45 = vsel %vm140_vm1, %v174_v36, 0.0 }
  0x97   :  { %v103_v39 = vadd.f32 %v102_v37, %v59_v19  ;;  %v106_v40 = vadd.f32 %v105_v38, %v64_v22  ;;  %v143_v54 = vadd.f32 %v142_v44, %v141_v41  ;;  %v179_v55 = vadd.f32 %v178_v45, %v177_v42 }
  0x98   :  { %v167_v48 = vpop.permute.xlu1 %166  ;;  %v171_v49 = vpop.permute.xlu0 %170 }
  0x99   :  { %v110_v46 = vmax.f32 %v103_v39, 0.0  ;;  %v111_v47 = vmax.f32 %v106_v40, 0.0 }
  0x9b   :  { %v138_v50 = vmul.f32 %v129_v24, %v110_v46  ;;  %v139_v51 = vmul.f32 %v134_v43, %v111_v47  ;;  %v175_v52 = vmul.f32 %v167_v48, %v110_v46  ;;  %v176_v53 = vmul.f32 %v171_v49, %v111_v47 }
  0x9d   :  { %v144_v56 = vsel %vm140_vm1, %v138_v50, 0.0  ;;  %v180_v57 = vsel %vm140_vm1, %v175_v52, 0.0  ;;  %v146_v60 = vsel %vm140_vm1, %v139_v51, 0.0  ;;  %v182_v61 = vsel %vm140_vm1, %v176_v53, 0.0 }
  0x9e   :  { %v145_v58 = vadd.f32 %v144_v56, %v143_v54  ;;  %v181_v59 = vadd.f32 %v180_v57, %v179_v55 }
  0xa0   :  { %v147_v62 = vadd.f32 %v146_v60, %v145_v58  ;;  %v183_v63 = vadd.f32 %v182_v61, %v181_v59 }
  0xa2   :  { %v148_v0 = vrot.slane %v147_v62, 4  ;;  %v184_v1 = vrot.slane %v183_v63, 4 }
  0xa4   :  { %v149_v2 = vadd.f32 %v148_v0, %v147_v62  ;;  %v185_v3 = vadd.f32 %v184_v1, %v183_v63 }
  0xa6   :  { %v150_v4 = vrot.slane %v149_v2, 2  ;;  %v186_v5 = vrot.slane %v185_v3, 2 }
  0xa8   :  { %v151_v6 = vadd.f32 %v150_v4, %v149_v2  ;;  %v187_v7 = vadd.f32 %v186_v5, %v185_v3 }
  0xaa   :  { %v152_v8 = vrot.slane %v151_v6, 1  ;;  %v188_v9 = vrot.slane %v187_v7, 1 }
  0xac   :  { %v153_v12 = vadd.f32 %v152_v8, %v151_v6  ;;  %v189_v13 = vadd.f32 %v188_v9, %v187_v7 }
  0xae   :  { %v156_v14 = vadd.f32 %v155_v10, %v153_v12  ;;  %v192_v15 = vadd.f32 %v191_v11, %v189_v13 }
  0xb0   :  { %v194_v16 = vsel %vm193_vm2, %v156_v14, %v192_v15 }
  0xb1   :  { %v196_v17 = vand.u32 2147483647, %v194_v16  ;;  %v195_v23 = vmax.f32 %v194_v16, 0.0 }
  0xb3   :  { %v197_v18 = vsub.f32 0.0, %v196_v17 }
  0xb5   :  { %v198_v19 = vmul.f32 1.442695, %v197_v18 }
  0xb7   :  { %249 = vpow2.f32 %v198_v19 }
  0xbd   :  { %v250_v20 = vpop.eup %249 }
  0xbe   :  { %v200_v21 = vadd.f32 1.0, %v250_v20 }
  0xc0   :  { %251 = vlog2.f32 %v200_v21 }
  0xc6   :  { %v252_v22 = vpop.eup %251 }
  0xc7   :  { %v202_v24 = vmul.f32 0.6931472, %v252_v22 }
  0xc9   :  { %v203_v25 = vadd.f32 %v202_v24, %v195_v23 }
  0xcb   :  { %205 = vst.msk [vmem:[#allocation5] sm:$0x3] %vm204_vm3, %v203_v25 }
  0xcc   :  { %216 = dma.vmem_to_hbm [thread:$0]  %s212_s27, 32, %s214_s29, [#allocation3]  }
  0xcd   :  { %291 = dma.done.wait [#allocation3], 32  }
  0xce   :  { %292 = vsyncadd [#allocation3], 4294967264 }
  0xcf   :  { %221 = vsyncpa [#allocation3], 1 }
  0xd0   :  { %222 = vsyncpa [#allocation4], 1 }

</bundles_post_ra>
